<compile_context>
chip_gen: v5e
topology: v5e:2x2
jax: 0.10.0
libtpu: 0.0.40
codegen_flags: <defaults>
</compile_context>

<pallas_src>
import jax
import jax.numpy as jnp
from jax.experimental import pallas as pl
from jax.experimental.pallas import tpu as pltpu

_LANES = 128
_SUBLANES = 8


def _mapa_kernel(t_ref, p_ref, o_ref, acc_ref):
    step = pl.program_id(1)

    @pl.when(step == 0)
    def _():
        acc_ref[...] = jnp.zeros_like(acc_ref)

    t = t_ref[...].astype(jnp.float32)
    p = p_ref[...].astype(jnp.float32)
    # |(t - p) / t| via approx reciprocal (single EUP op, own VLIW slot).
    err = jnp.abs((t - p) * pl.reciprocal(t, approx=True))
    # Fold the (tile_rows, 128) tile into vreg-shaped (8, 128) chunks and
    # accumulate with plain VALU adds; no cross-lane reduce in the hot loop.
    acc_ref[...] += jnp.sum(err.reshape(-1, _SUBLANES, _LANES), axis=0)

    @pl.when(step == pl.num_programs(1) - 1)
    def _():
        o_ref[...] = acc_ref[...]


def _round_up(x, m):
    return ((x + m - 1) // m) * m


def _cdiv(a, b):
    return (a + b - 1) // b


def mapa(y_truth, y_pred, *, max_tile_rows=4096):
    """1 - mean(|(y_truth - y_pred) / y_truth|), computed in a Pallas kernel."""
    assert y_truth.shape == y_pred.shape
    total_n = int(y_truth.size)

    rows = _cdiv(total_n, _LANES)
    # Biggest tile that fits a comfortable VMEM budget; small inputs -> one step.
    tile_rows = min(_round_up(rows, _SUBLANES), max_tile_rows)
    total_tiles = _cdiv(rows, tile_rows)
    # Use both TensorCores on v7x (harmless serial split on 1-TC chips) once
    # there is enough work to amortize the extra padded tile.
    num_splits = 2 if total_tiles >= 4 else 1
    steps = _cdiv(total_tiles, num_splits)
    padded_rows = num_splits * steps * tile_rows
    padded_n = padded_rows * _LANES

    t = jnp.ravel(y_truth)
    p = jnp.ravel(y_pred)
    pad = padded_n - total_n
    if pad:
        # Pad with (t=1, p=1) so padded elements contribute |(1-1)/1| = 0.
        t = jnp.concatenate([t, jnp.ones((pad,), dtype=t.dtype)])
        p = jnp.concatenate([p, jnp.ones((pad,), dtype=p.dtype)])
    # Native dtype; the f32 upcast happens inside the kernel (free VPU filler).
    t2d = t.reshape(padded_rows, _LANES)
    p2d = p.reshape(padded_rows, _LANES)

    partials = pl.pallas_call(
        _mapa_kernel,
        out_shape=jax.ShapeDtypeStruct((num_splits * _SUBLANES, _LANES), jnp.float32),
        grid_spec=pltpu.PrefetchScalarGridSpec(
            num_scalar_prefetch=0,
            grid=(num_splits, steps),
            in_specs=[
                pl.BlockSpec((tile_rows, _LANES), lambda s, i: (s * steps + i, 0)),
                pl.BlockSpec((tile_rows, _LANES), lambda s, i: (s * steps + i, 0)),
            ],
            out_specs=pl.BlockSpec((_SUBLANES, _LANES), lambda s, i: (s, 0)),
            scratch_shapes=[pltpu.VMEM((_SUBLANES, _LANES), jnp.float32)],
        ),
        compiler_params=pltpu.CompilerParams(
            dimension_semantics=("parallel", "arbitrary"),
            vmem_limit_bytes=32 * 1024 * 1024,
        ),
    )(t2d, p2d)

    # Final cross-lane/sublane reduce + normalization by the TRUE element count.
    return 1.0 - jnp.sum(partials) / total_n


if __name__ == "__main__":
    # Small shapes consistent with the module's forward: two same-shape tensors.
    # (2, 4, 16, 16) -> 2048 elements -> single (16, 128) tile, one grid step.
    key = jax.random.PRNGKey(0)
    k_t, k_p = jax.random.split(key)
    shape = (2, 4, 16, 16)
    # y_truth kept away from zero so the division is well defined (the
    # reference would also blow up at 0).
    y_truth = jax.random.uniform(k_t, shape, dtype=jnp.float32, minval=0.5, maxval=1.5)
    y_pred = y_truth + 0.1 * jax.random.normal(k_p, shape, dtype=jnp.float32)

    result = mapa(y_truth, y_pred)
    jax.block_until_ready(result)

    # Reference check in plain JAX (same math as the PyTorch/numpy module).
    # Slightly looser tolerance because of the approximate reciprocal.
    ref = 1.0 - jnp.mean(jnp.abs((y_truth - y_pred) / y_truth))
    assert jnp.allclose(result, ref, rtol=1e-3, atol=1e-3), (result, ref)

    print("KERNEL_OK")
</pallas_src>

<mosaic_0001>
module attributes {stable_mosaic.version = 11 : i64} {
  func.func @_mapa_kernel(%arg0: i32, %arg1: i32, %arg2: memref<16x128xf32, #tpu.memory_space<vmem>>, %arg3: memref<16x128xf32, #tpu.memory_space<vmem>>, %arg4: memref<8x128xf32, #tpu.memory_space<vmem>>, %arg5: memref<8x128xf32, #tpu.memory_space<vmem>>) attributes {dimension_semantics = [#tpu.dimension_semantics<parallel>, #tpu.dimension_semantics<arbitrary>], iteration_bounds = array<i64: 1, 1>, scalar_prefetch = 0 : i64, scratch_operands = 1 : i64, tpu.core_type = #tpu.core_type<tc>, window_params = [{transform_indices = @transform_0, window_bounds = array<i64: 16, 128>}, {transform_indices = @transform_1, window_bounds = array<i64: 16, 128>}, {transform_indices = @transform_2, window_bounds = array<i64: 8, 128>}]} {
    %c0_i32 = arith.constant 0 : i32
    %0 = arith.cmpi eq, %arg1, %c0_i32 : i32
    %1 = arith.extui %0 : i1 to i32
    %c0_i32_0 = arith.constant 0 : i32
    %2 = arith.cmpi ne, %1, %c0_i32_0 : i32
    scf.if %2 {
      %cst_10 = arith.constant 0.000000e+00 : f32
      %17 = vector.broadcast %cst_10 : f32 to vector<8x128xf32>
      %c0_11 = arith.constant 0 : index
      %c0_12 = arith.constant 0 : index
      %18 = vector.load %arg5[%c0_11, %c0_12] : memref<8x128xf32, #tpu.memory_space<vmem>>, vector<8x128xf32>
      tpu.vector_store %arg5[%c0_11, %c0_12], %17 {strides = array<i32>} : memref<8x128xf32, #tpu.memory_space<vmem>>, vector<8x128xf32>,
    } else {
    }
    %c0 = arith.constant 0 : index
    %c0_1 = arith.constant 0 : index
    %3 = vector.load %arg2[%c0, %c0_1] : memref<16x128xf32, #tpu.memory_space<vmem>>, vector<16x128xf32>
    %c0_2 = arith.constant 0 : index
    %c0_3 = arith.constant 0 : index
    %4 = vector.load %arg3[%c0_2, %c0_3] : memref<16x128xf32, #tpu.memory_space<vmem>>, vector<16x128xf32>
    %5 = arith.subf %3, %4 : vector<16x128xf32>
    %6 = tpu.reciprocal %3 {approx = true} : vector<16x128xf32> -> vector<16x128xf32>
    %7 = arith.mulf %5, %6 : vector<16x128xf32>
    %8 = math.absf %7 : vector<16x128xf32>
    %c0_4 = arith.constant 0 : index
    %c0_5 = arith.constant 0 : index
    %9 = vector.load %arg5[%c0_4, %c0_5] : memref<8x128xf32, #tpu.memory_space<vmem>>, vector<8x128xf32>
    %10 = vector.shape_cast %8 : vector<16x128xf32> to vector<2x8x128xf32>
    %cst = arith.constant dense<0.000000e+00> : vector<8x128xf32>
    %11 = vector.multi_reduction <add>, %10, %cst [0] : vector<2x8x128xf32> to vector<8x128xf32>
    %12 = arith.addf %9, %11 : vector<8x128xf32>
    %c0_6 = arith.constant 0 : index
    %c0_7 = arith.constant 0 : index
    %13 = vector.load %arg5[%c0_6, %c0_7] : memref<8x128xf32, #tpu.memory_space<vmem>>, vector<8x128xf32>
    tpu.vector_store %arg5[%c0_6, %c0_7], %12 {strides = array<i32>} : memref<8x128xf32, #tpu.memory_space<vmem>>, vector<8x128xf32>,
    %c0_i32_8 = arith.constant 0 : i32
    %14 = arith.cmpi eq, %arg1, %c0_i32_8 : i32
    %15 = arith.extui %14 : i1 to i32
    %c0_i32_9 = arith.constant 0 : i32
    %16 = arith.cmpi ne, %15, %c0_i32_9 : i32
    scf.if %16 {
      %c0_10 = arith.constant 0 : index
      %c0_11 = arith.constant 0 : index
      %17 = vector.load %arg5[%c0_10, %c0_11] : memref<8x128xf32, #tpu.memory_space<vmem>>, vector<8x128xf32>
      %c0_12 = arith.constant 0 : index
      %c0_13 = arith.constant 0 : index
      %18 = vector.load %arg4[%c0_12, %c0_13] : memref<8x128xf32, #tpu.memory_space<vmem>>, vector<8x128xf32>
      tpu.vector_store %arg4[%c0_12, %c0_13], %17 {strides = array<i32>} : memref<8x128xf32, #tpu.memory_space<vmem>>, vector<8x128xf32>,
    } else {
    }
    return
  }
  func.func @transform_0(%arg0: i32, %arg1: i32) -> (i32, i32) {
    %c1_i32 = arith.constant 1 : i32
    %0 = arith.muli %arg0, %c1_i32 : i32
    %1 = arith.addi %0, %arg1 : i32
    %c0_i32 = arith.constant 0 : i32
    %c0_i32_0 = arith.constant 0 : i32
    return %1, %c0_i32 : i32, i32
  }
  func.func @transform_1(%arg0: i32, %arg1: i32) -> (i32, i32) {
    %c1_i32 = arith.constant 1 : i32
    %0 = arith.muli %arg0, %c1_i32 : i32
    %1 = arith.addi %0, %arg1 : i32
    %c0_i32 = arith.constant 0 : i32
    %c0_i32_0 = arith.constant 0 : i32
    return %1, %c0_i32 : i32, i32
  }
  func.func @transform_2(%arg0: i32, %arg1: i32) -> (i32, i32) {
    %c0_i32 = arith.constant 0 : i32
    %c0_i32_0 = arith.constant 0 : i32
    return %arg0, %c0_i32 : i32, i32
  }
}

</mosaic_0001>

<bundles_post_ra>
// kernel: tpu_custom_call.1
= control target key start
LH: loop header
LB: loop body
LE: loop exit
PB: predicated region body
PF: predicated region fallthrough
CT: control target
= control target key end

     0   :  { %7 = vsyncpa [#allocation4], 0  ;;  %s216_s0 = inlined_call_operand.hbm [shape: f32[16,128], index: 0, kind: input, shape index: {}]   ;;  %s217_s1 = inlined_call_operand.hbm [shape: f32[16,128], index: 1, kind: input, shape index: {}]   ;;  %s218_s2 = inlined_call_operand.hbm [shape: f32[8,128], index: 2, kind: output, shape index: {}]  }
   0x1   :  { %8 = vsyncpa [#allocation7], 0 }
   0x2   :  { %9 = vsyncpa [#allocation5], 0  ;;  %s18_s11 = sshll.u32 %s216_s0, 4  ;;  %s187_s12 = smov [#allocation3]   ;;  %s19_s11 = int_to_ptr.hbm [resolvable:$true] %s18_s11 }
   0x3   :  { %s20_s13 = sshll.u32 %s187_s12, 4  ;;  %s35_s16 = sshll.u32 %s217_s1, 4  ;;  %s21_s13 = int_to_ptr.vmem [resolvable:$true] %s20_s13  ;;  %s36_s16 = int_to_ptr.hbm [resolvable:$true] %s35_s16 }
   0x4   :  { %s188_s17 = smov 128   ;;  %s189_s18 = smov 8  }
   0x5   :  { %26 = dma.hbm_to_vmem [thread:$0]  %s19_s11, 256, %s21_s13, [#allocation4], %s188_s17, %s188_s17, %s189_s18  }
   0x6   :  { %s190_s19 = smov [#allocation6]  }
   0x7   :  { %s37_s20 = sshll.u32 %s190_s19, 4  ;;  %s38_s20 = int_to_ptr.vmem [resolvable:$true] %s37_s20 }
   0x8   :  { %43 = dma.hbm_to_vmem [thread:$0]  %s36_s16, 256, %s38_s20, [#allocation7], %s188_s17, %s188_s17, %s189_s18  }
   0x9   :  { %181 = dma.done.wait [#allocation4], 256  }
   0xa   :  { %182 = vsyncadd [#allocation4], 4294967040 }
   0xb   :  { %183 = dma.done.wait [#allocation7], 256  }
   0xc   :  { %184 = vsyncadd [#allocation7], 4294967040  ;;  %v61_v0 = vld [vmem:[#allocation3] sm:$0xff]  ;;  %v62_v1 = vld [vmem:[#allocation3 + $0x8] sm:$0xff]  ;;  %s191_s0 = smov [#allocation8]   ;;  %s89_s23 = sshll.u32 %s218_s2, 4  ;;  %s90_s23 = int_to_ptr.hbm [resolvable:$true] %s89_s23 }
   0xd   :  { %v63_v2 = vld [vmem:[#allocation6] sm:$0xff]  ;;  %105 = vrcp.f32 %v61_v0  ;;  %v64_v3 = vld [vmem:[#allocation6 + $0x8] sm:$0xff]  ;;  %s87_s1 = sshll.u32 %s191_s0, 4  ;;  %s88_s1 = int_to_ptr.vmem [resolvable:$true] %s87_s1 }
   0xe   :  { %107 = vrcp.f32 %v62_v1  ;;  %v65_v4 = vsub.f32 %v61_v0, %v63_v2  ;;  %v66_v5 = vsub.f32 %v62_v1, %v64_v3 }
  0x13   :  { %v106_v6 = vpop.eup %105 }
  0x14   :  { %v108_v7 = vpop.eup %107  ;;  %v69_v8 = vmul.f32 %v106_v6, %v65_v4 }
  0x15   :  { %v70_v9 = vmul.f32 %v108_v7, %v66_v5 }
  0x16   :  { %v71_v10 = vand.u32 2147483647, %v69_v8 }
  0x17   :  { %v72_v11 = vand.u32 2147483647, %v70_v9 }
  0x19   :  { %v74_v12 = vadd.f32 %v72_v11, %v71_v10 }
  0x1b   :  { %81 = vst [vmem:[#allocation8] sm:$0xff] %v74_v12 }
  0x1c   :  { %92 = dma.vmem_to_hbm [thread:$0]  %s88_s1, 128, %s90_s23, [#allocation5]  }
  0x1d   :  { %185 = dma.done.wait [#allocation5], 128  }
  0x1e   :  { %186 = vsyncadd [#allocation5], 4294967168 }
  0x1f   :  { %97 = vsyncpa [#allocation4], 1 }
  0x20   :  { %98 = vsyncpa [#allocation7], 1 }
  0x21   :  { %99 = vsyncpa [#allocation5], 1 }

</bundles_post_ra>
